<compile_context>
chip_gen: v5e
topology: v5e:2x2
jax: 0.10.0
libtpu: 0.0.40
codegen_flags: <defaults>
</compile_context>

<pallas_src>
import functools

import jax
import jax.numpy as jnp
from jax.experimental import pallas as pl
from jax.experimental.pallas import tpu as pltpu


def _round_up(x, m):
    return ((x + m - 1) // m) * m


def _gelu(h, approx):
    if approx:
        return jax.nn.gelu(h, approximate=True)
    # exact erf GELU (torch nn.GELU default), kept in f32 on the VPU
    return 0.5 * h * (1.0 + jax.lax.erf(h * 0.7071067811865476))


# ---------------------------------------------------------------------------
# Kernel A: weights fully VMEM-resident (tile_h == H).  1-D grid over row
# tiles; no accumulator scratch, no pl.when — direct compute + store.
# ---------------------------------------------------------------------------
def _mlp_kernel_fullh(approx_gelu, x_ref, w1_ref, b1_ref, w2_ref, b2_ref, out_ref):
    x = x_ref[...]
    w1 = w1_ref[...]
    if x.dtype != w1.dtype:
        x = x.astype(w1.dtype)
    h = jnp.dot(x, w1, preferred_element_type=jnp.float32) + b1_ref[...]
    h = _gelu(h, approx_gelu)
    y = jnp.dot(h.astype(w2_ref.dtype), w2_ref[...],
                preferred_element_type=jnp.float32) + b2_ref[...]
    out_ref[...] = y.astype(out_ref.dtype)


# ---------------------------------------------------------------------------
# Kernel B: hidden dimension tiled (fc2 contraction split).  2-D grid
# (row tiles, hidden tiles); f32 VMEM accumulator, reduction axis last.
# ---------------------------------------------------------------------------
def _mlp_kernel_htiled(approx_gelu, x_ref, w1_ref, b1_ref, w2_ref, b2_ref,
                       out_ref, acc_ref):
    h_idx = pl.program_id(1)

    @pl.when(h_idx == 0)
    def _():
        acc_ref[...] = jnp.zeros_like(acc_ref)

    x = x_ref[...]
    w1 = w1_ref[...]
    if x.dtype != w1.dtype:
        x = x.astype(w1.dtype)
    h = jnp.dot(x, w1, preferred_element_type=jnp.float32) + b1_ref[...]
    h = _gelu(h, approx_gelu)
    acc_ref[...] += jnp.dot(h.astype(w2_ref.dtype), w2_ref[...],
                            preferred_element_type=jnp.float32)

    @pl.when(h_idx == pl.num_programs(1) - 1)
    def _():
        out_ref[...] = (acc_ref[...] + b2_ref[...]).astype(out_ref.dtype)


# ---------------------------------------------------------------------------
# One-time parameter preprocessing (do this at load time, NOT per forward).
# ---------------------------------------------------------------------------
def prepare_mlp_params(params, *, compute_dtype=jnp.float32, hidden_align=128):
    """Transpose PyTorch-layout weights to [in, out], cast MXU operands to
    compute_dtype, pad hidden to a lane multiple, keep biases in f32."""
    compute_dtype = jnp.dtype(compute_dtype)
    w1, b1 = params["fc1_w"], params["fc1_b"]      # (H, D_in), (H,)
    w2, b2 = params["fc2_w"], params["fc2_b"]      # (D_out, H), (D_out,)
    hidden, d_in = w1.shape
    d_out = w2.shape[0]
    assert w2.shape[1] == hidden

    h_pad = _round_up(hidden, hidden_align)
    w1_t = jnp.asarray(w1).T.astype(compute_dtype)           # (D_in, H)
    w2_t = jnp.asarray(w2).T.astype(compute_dtype)           # (H, D_out)
    b1_r = jnp.asarray(b1).reshape(1, hidden).astype(jnp.float32)
    b2_r = jnp.asarray(b2).reshape(1, d_out).astype(jnp.float32)
    if h_pad != hidden:
        # zero-padded hidden columns contribute GELU(0) * 0-rows = 0
        w1_t = jnp.pad(w1_t, ((0, 0), (0, h_pad - hidden)))
        b1_r = jnp.pad(b1_r, ((0, 0), (0, h_pad - hidden)))
        w2_t = jnp.pad(w2_t, ((0, h_pad - hidden), (0, 0)))
    return dict(w1_t=w1_t, b1=b1_r, w2_t=w2_t, b2=b2_r,
                d_in=d_in, d_out=d_out, hidden=hidden, h_pad=h_pad,
                compute_dtype=compute_dtype)


def _vmem_budget_bytes():
    """Scoped-VMEM ceiling, generation-aware (v7x: 64 MiB per TensorCore)."""
    cap = 64 * 1024 * 1024
    try:
        info = pltpu.get_tpu_info()
        cap = int(getattr(info, "vmem_capacity_bytes", cap))
    except Exception:
        pass
    cap = max(cap, 32 * 1024 * 1024)
    return min(int(cap * 0.9), 100 * 1024 * 1024)


def _pick_tm(n, tile_m, sub):
    """Row-tile size: >= 2 row tiles when possible (megacore), sublane-aligned."""
    tile_m = max(sub, _round_up(tile_m, sub))
    if n > tile_m:
        return tile_m
    full = _round_up(n, sub)
    half = _round_up(max(1, (n + 1) // 2), sub)
    return half if half < full else full


# ---------------------------------------------------------------------------
# Forward wrapper
# ---------------------------------------------------------------------------
def mlp_forward(x, prepared, *, tile_m=None, tile_h=None, approx_gelu=False):
    """Fused Mlp forward.  `prepared` comes from prepare_mlp_params()."""
    compute_dtype = prepared["compute_dtype"]
    d_in, d_out = prepared["d_in"], prepared["d_out"]
    h_pad = prepared["h_pad"]
    w1_t, b1_r = prepared["w1_t"], prepared["b1"]
    w2_t, b2_r = prepared["w2_t"], prepared["b2"]

    orig_dtype = x.dtype
    lead = x.shape[:-1]
    assert x.shape[-1] == d_in
    n = 1
    for s in lead:
        n *= s
    x2 = x.reshape(n, d_in)
    # bf16 operand path: DMA/hold the x tile in bf16 (no per-step VPU cast)
    if compute_dtype == jnp.bfloat16 and x2.dtype != jnp.bfloat16:
        x2 = x2.astype(jnp.bfloat16)

    x_bytes = x2.dtype.itemsize
    c_bytes = compute_dtype.itemsize
    o_bytes = jnp.dtype(orig_dtype).itemsize
    sub = 16 if x2.dtype == jnp.bfloat16 else 8          # sublane multiple

    vmem_cap = _vmem_budget_bytes()
    weight_bytes_full = (d_in * h_pad + h_pad * d_out) * c_bytes

    # ---- decide hidden tiling ------------------------------------------
    if tile_h is None:
        # Auto: keep weights fully VMEM-resident when they comfortably fit
        # (counting double buffers); otherwise stream ~2048-wide slabs.
        full_h = (2 * weight_bytes_full) <= int(0.6 * vmem_cap)
    else:
        full_h = tile_h >= h_pad

    if full_h:
        th = h_pad
        tm = _pick_tm(n, 256 if tile_m is None else tile_m, sub)
    else:
        th = max(128, _round_up(tile_h if tile_h is not None else 2048, 128))
        if th >= 256:
            th = _round_up(th, 256)                       # v6e/v7x 256x256 MXU
        th = min(th, h_pad)
        tm = _pick_tm(n, 512 if tile_m is None else tile_m, sub)
        h_pad_eff = _round_up(h_pad, th)
        if h_pad_eff != h_pad:
            # Rare (H not a multiple of th) — per-call pad.  Prefer th that
            # divides the prepared h_pad to keep this out of the hot path.
            w1_t = jnp.pad(w1_t, ((0, 0), (0, h_pad_eff - h_pad)))
            b1_r = jnp.pad(b1_r, ((0, 0), (0, h_pad_eff - h_pad)))
            w2_t = jnp.pad(w2_t, ((0, h_pad_eff - h_pad), (0, 0)))
            h_pad = h_pad_eff

    # ---- row padding -----------------------------------------------------
    n_pad = _round_up(n, tm)
    if n_pad != n:
        x2 = jnp.pad(x2, ((0, n_pad - n), (0, 0)))

    if full_h:
        est = (2 * tm * d_in * x_bytes
               + 2 * weight_bytes_full
               + 2 * (th + d_out) * 4
               + 2 * tm * d_out * o_bytes)
        vmem_limit = int(min(max(2 * est, 32 * 1024 * 1024), vmem_cap))
        out = pl.pallas_call(
            functools.partial(_mlp_kernel_fullh, approx_gelu),
            out_shape=jax.ShapeDtypeStruct((n_pad, d_out), orig_dtype),
            grid=(n_pad // tm,),
            in_specs=[
                pl.BlockSpec((tm, d_in),  lambda m: (m, 0)),   # x row tile
                pl.BlockSpec((d_in, th),  lambda m: (0, 0)),   # fc1 W^T (resident)
                pl.BlockSpec((1, th),     lambda m: (0, 0)),   # fc1 bias
                pl.BlockSpec((th, d_out), lambda m: (0, 0)),   # fc2 W^T (resident)
                pl.BlockSpec((1, d_out),  lambda m: (0, 0)),   # fc2 bias
            ],
            out_specs=pl.BlockSpec((tm, d_out), lambda m: (m, 0)),
            compiler_params=pltpu.CompilerParams(
                dimension_semantics=("parallel",),
                vmem_limit_bytes=vmem_limit),
        )(x2, w1_t, b1_r, w2_t, b2_r)
    else:
        est = (2 * tm * d_in * x_bytes
               + 2 * (d_in + d_out) * th * c_bytes
               + 2 * (th + d_out) * 4
               + 2 * tm * d_out * o_bytes
               + tm * d_out * 4)
        vmem_limit = int(min(max(2 * est, 32 * 1024 * 1024), vmem_cap))
        out = pl.pallas_call(
            functools.partial(_mlp_kernel_htiled, approx_gelu),
            out_shape=jax.ShapeDtypeStruct((n_pad, d_out), orig_dtype),
            grid=(n_pad // tm, h_pad // th),
            in_specs=[
                pl.BlockSpec((tm, d_in),  lambda m, h: (m, 0)),  # x row tile
                pl.BlockSpec((d_in, th),  lambda m, h: (0, h)),  # fc1 W^T slab
                pl.BlockSpec((1, th),     lambda m, h: (0, h)),  # fc1 bias slab
                pl.BlockSpec((th, d_out), lambda m, h: (h, 0)),  # fc2 W^T slab
                pl.BlockSpec((1, d_out),  lambda m, h: (0, 0)),  # fc2 bias
            ],
            out_specs=pl.BlockSpec((tm, d_out), lambda m, h: (m, 0)),
            scratch_shapes=[pltpu.VMEM((tm, d_out), jnp.float32)],
            compiler_params=pltpu.CompilerParams(
                dimension_semantics=("parallel", "arbitrary"),
                vmem_limit_bytes=vmem_limit),
        )(x2, w1_t, b1_r, w2_t, b2_r)

    return out[:n].reshape(*lead, d_out)


# ---------------------------------------------------------------------------
# Pure-JAX reference (matches torch eval-mode Mlp)
# ---------------------------------------------------------------------------
def _reference(x, p):
    h = x @ p["fc1_w"].T + p["fc1_b"]
    h = 0.5 * h * (1.0 + jax.lax.erf(h * 0.7071067811865476))
    return h @ p["fc2_w"].T + p["fc2_b"]


# ---------------------------------------------------------------------------
if __name__ == "__main__":
    B, L = 2, 8
    D_IN, HIDDEN, D_OUT = 32, 256, 32

    key = jax.random.PRNGKey(0)
    ks = jax.random.split(key, 8)

    def w(k, shape, scale=0.05):
        return (scale * jax.random.normal(k, shape)).astype(jnp.float32)

    params = {
        "fc1_w": w(ks[0], (HIDDEN, D_IN)),
        "fc1_b": w(ks[1], (HIDDEN,)),
        "fc2_w": w(ks[2], (D_OUT, HIDDEN)),
        "fc2_b": w(ks[3], (D_OUT,)),
    }
    x = jax.random.normal(ks[4], (B, L, D_IN), jnp.float32)
    ref = _reference(x, params)

    # --- f32, weight-resident fast path (auto tile_h = H, no accumulator) ---
    prep_f32 = prepare_mlp_params(params, compute_dtype=jnp.float32)
    out = jax.block_until_ready(mlp_forward(x, prep_f32))
    assert out.shape == (B, L, D_OUT)
    assert jnp.allclose(out, ref, atol=1e-4, rtol=1e-4), (
        float(jnp.max(jnp.abs(out - ref))))

    # --- f32, H-tiled reduction path (exercises acc scratch + pl.when) ------
    out_t = jax.block_until_ready(mlp_forward(x, prep_f32, tile_m=8, tile_h=128))
    assert jnp.allclose(out_t, ref, atol=1e-4, rtol=1e-4), (
        float(jnp.max(jnp.abs(out_t - ref))))

    # --- ragged shapes: row padding + hidden zero-padding --------------------
    params_r = {
        "fc1_w": w(ks[5], (200, 20)),
        "fc1_b": w(ks[6], (200,)),
        "fc2_w": w(ks[7], (24, 200)),
        "fc2_b": jnp.zeros((24,), jnp.float32),
    }
    x_r = jax.random.normal(ks[4], (3, 5, 20), jnp.float32)
    ref_r = _reference(x_r, params_r)
    prep_r = prepare_mlp_params(params_r, compute_dtype=jnp.float32)
    out_r = jax.block_until_ready(mlp_forward(x_r, prep_r))
    assert out_r.shape == (3, 5, 24)
    assert jnp.allclose(out_r, ref_r, atol=1e-4, rtol=1e-4), (
        float(jnp.max(jnp.abs(out_r - ref_r))))
    out_rt = jax.block_until_ready(mlp_forward(x_r, prep_r, tile_m=8, tile_h=128))
    assert jnp.allclose(out_rt, ref_r, atol=1e-4, rtol=1e-4), (
        float(jnp.max(jnp.abs(out_rt - ref_r))))

    # --- bf16 MXU-operand path (f32 accumulation/elementwise), loose check ---
    prep_bf = prepare_mlp_params(params, compute_dtype=jnp.bfloat16)
    out_bf = jax.block_until_ready(mlp_forward(x, prep_bf))
    assert jnp.allclose(out_bf, ref, atol=5e-2, rtol=5e-2), (
        float(jnp.max(jnp.abs(out_bf - ref))))

    print("KERNEL_OK")
</pallas_src>

<mosaic_0001>
module attributes {stable_mosaic.version = 11 : i64} {
  func.func @_mlp_kernel_fullh(%arg0: i32, %arg1: memref<8x32xf32, #tpu.memory_space<vmem>>, %arg2: memref<32x256xf32, #tpu.memory_space<vmem>>, %arg3: memref<1x256xf32, #tpu.memory_space<vmem>>, %arg4: memref<256x32xf32, #tpu.memory_space<vmem>>, %arg5: memref<1x32xf32, #tpu.memory_space<vmem>>, %arg6: memref<8x32xf32, #tpu.memory_space<vmem>>) attributes {dimension_semantics = [#tpu.dimension_semantics<parallel>], iteration_bounds = array<i64: 2>, scalar_prefetch = 0 : i64, scratch_operands = 0 : i64, tpu.core_type = #tpu.core_type<tc>, window_params = [{transform_indices = @transform_0, window_bounds = array<i64: 8, 32>}, {pipeline_mode = #tpu.pipeline_mode<synchronous>, transform_indices = @transform_1, window_bounds = array<i64: 32, 256>}, {pipeline_mode = #tpu.pipeline_mode<synchronous>, transform_indices = @transform_2, window_bounds = array<i64: 1, 256>}, {pipeline_mode = #tpu.pipeline_mode<synchronous>, transform_indices = @transform_3, window_bounds = array<i64: 256, 32>}, {pipeline_mode = #tpu.pipeline_mode<synchronous>, transform_indices = @transform_4, window_bounds = array<i64: 1, 32>}, {transform_indices = @transform_5, window_bounds = array<i64: 8, 32>}]} {
    %c0 = arith.constant 0 : index
    %c0_0 = arith.constant 0 : index
    %0 = vector.load %arg1[%c0, %c0_0] : memref<8x32xf32, #tpu.memory_space<vmem>>, vector<8x32xf32>
    %c0_1 = arith.constant 0 : index
    %c0_2 = arith.constant 0 : index
    %1 = vector.load %arg2[%c0_1, %c0_2] : memref<32x256xf32, #tpu.memory_space<vmem>>, vector<32x256xf32>
    %cst = arith.constant dense<0.000000e+00> : vector<8x256xf32>
    %2 = tpu.matmul %0, %1, %cst {dimension_numbers = #tpu.dot_dimension_numbers<[1], [0], [0], [1], [0, 0, 1, 1], [], []>} : vector<8x32xf32>, vector<32x256xf32>, vector<8x256xf32> -> vector<8x256xf32>
    %c0_3 = arith.constant 0 : index
    %c0_4 = arith.constant 0 : index
    %3 = vector.load %arg3[%c0_3, %c0_4] : memref<1x256xf32, #tpu.memory_space<vmem>>, vector<1x256xf32>
    %4 = vector.broadcast %3 : vector<1x256xf32> to vector<8x256xf32>
    %5 = arith.addf %2, %4 : vector<8x256xf32>
    %cst_5 = arith.constant 5.000000e-01 : f32
    %6 = vector.broadcast %cst_5 : f32 to vector<8x256xf32>
    %7 = arith.mulf %6, %5 : vector<8x256xf32>
    %cst_6 = arith.constant 0.707106769 : f32
    %8 = vector.broadcast %cst_6 : f32 to vector<8x256xf32>
    %9 = arith.mulf %5, %8 : vector<8x256xf32>
    %10 = math.erf %9 : vector<8x256xf32>
    %cst_7 = arith.constant 1.000000e+00 : f32
    %11 = vector.broadcast %cst_7 : f32 to vector<8x256xf32>
    %12 = arith.addf %11, %10 : vector<8x256xf32>
    %13 = arith.mulf %7, %12 : vector<8x256xf32>
    %c0_8 = arith.constant 0 : index
    %c0_9 = arith.constant 0 : index
    %14 = vector.load %arg4[%c0_8, %c0_9] : memref<256x32xf32, #tpu.memory_space<vmem>>, vector<256x32xf32>
    %cst_10 = arith.constant dense<0.000000e+00> : vector<8x32xf32>
    %15 = tpu.matmul %13, %14, %cst_10 {dimension_numbers = #tpu.dot_dimension_numbers<[1], [0], [0], [1], [0, 0, 1, 1], [], []>} : vector<8x256xf32>, vector<256x32xf32>, vector<8x32xf32> -> vector<8x32xf32>
    %c0_11 = arith.constant 0 : index
    %c0_12 = arith.constant 0 : index
    %16 = vector.load %arg5[%c0_11, %c0_12] : memref<1x32xf32, #tpu.memory_space<vmem>>, vector<1x32xf32>
    %17 = vector.broadcast %16 : vector<1x32xf32> to vector<8x32xf32>
    %18 = arith.addf %15, %17 : vector<8x32xf32>
    %c0_13 = arith.constant 0 : index
    %c0_14 = arith.constant 0 : index
    %19 = vector.load %arg6[%c0_13, %c0_14] : memref<8x32xf32, #tpu.memory_space<vmem>>, vector<8x32xf32>
    tpu.vector_store %arg6[%c0_13, %c0_14], %18 {strides = array<i32>} : memref<8x32xf32, #tpu.memory_space<vmem>>, vector<8x32xf32>,
    return
  }
  func.func @transform_0(%arg0: i32) -> (i32, i32) {
    %c0_i32 = arith.constant 0 : i32
    %c0_i32_0 = arith.constant 0 : i32
    return %arg0, %c0_i32 : i32, i32
  }
  func.func @transform_1(%arg0: i32) -> (i32, i32) {
    %c0_i32 = arith.constant 0 : i32
    %c0_i32_0 = arith.constant 0 : i32
    %c0_i32_1 = arith.constant 0 : i32
    return %c0_i32, %c0_i32_0 : i32, i32
  }
  func.func @transform_2(%arg0: i32) -> (i32, i32) {
    %c0_i32 = arith.constant 0 : i32
    %c0_i32_0 = arith.constant 0 : i32
    %c0_i32_1 = arith.constant 0 : i32
    return %c0_i32, %c0_i32_0 : i32, i32
  }
  func.func @transform_3(%arg0: i32) -> (i32, i32) {
    %c0_i32 = arith.constant 0 : i32
    %c0_i32_0 = arith.constant 0 : i32
    %c0_i32_1 = arith.constant 0 : i32
    return %c0_i32, %c0_i32_0 : i32, i32
  }
  func.func @transform_4(%arg0: i32) -> (i32, i32) {
    %c0_i32 = arith.constant 0 : i32
    %c0_i32_0 = arith.constant 0 : i32
    %c0_i32_1 = arith.constant 0 : i32
    return %c0_i32, %c0_i32_0 : i32, i32
  }
  func.func @transform_5(%arg0: i32) -> (i32, i32) {
    %c0_i32 = arith.constant 0 : i32
    %c0_i32_0 = arith.constant 0 : i32
    return %arg0, %c0_i32 : i32, i32
  }
}

</mosaic_0001>

<bundles_post_ra>
// kernel: tpu_custom_call.1
= control target key start
LH: loop header
LB: loop body
LE: loop exit
PB: predicated region body
PF: predicated region fallthrough
CT: control target
= control target key end

     0   :  { %10 = vsyncpa [#allocation3], 0  ;;  %s927_s0 = inlined_call_operand.vmem [shape: f32[16,32], index: 0, kind: input, shape index: {}]   ;;  %s928_s1 = inlined_call_operand.vmem [shape: f32[32,256], index: 1, kind: input, shape index: {}]   ;;  %s929_s2 = inlined_call_operand.vmem [shape: f32[1,256], index: 2, kind: input, shape index: {}]   ;;  %s930_s3 = inlined_call_operand.vmem [shape: f32[256,32], index: 3, kind: input, shape index: {}]   ;;  %s931_s4 = inlined_call_operand.vmem [shape: f32[1,32], index: 4, kind: input, shape index: {}]   ;;  %s932_s5 = inlined_call_operand.hbm [shape: f32[16,32], index: 5, kind: output, shape index: {}]  }
   0x1   :  { %12 = vsyncpa [#allocation3 + $0x1], 0  ;;  %s671_s18 = smov 0   ;;  %s673_s19 = smov 0  }
   0x2   :  { %s675_s20 = smov 0   ;;  %s677_s21 = smov 0  }
   0x3 LB: > { %s692_s22 = sadd.s32 4294967295, %s639_s21   ;;  %s519_s23 = sadd.s32 4294967294, %s639_s21   ;;  %s639_s21 = sphi %s677_s21, %s938_s21   ;;  %s635_s20 = sphi %s675_s20, %s937_s20   ;;  %s631_s19 = sphi %s673_s19, %s936_s19   ;;  %s627_s18 = sphi %s671_s18, %s935_s18  }
   0x4   : > { %s696_s24 = sadd.s32 1, %s639_s21   ;;  %s135_s25 = sadd.s32 1, %s635_s20 }
   0x5   : > { %s132_s26 = ssub.s32 %s639_s21, %s696_s24  ;;  %p145_p0 = scmp.ne.s32.totalorder %s635_s20, %s631_s19 }
   0x6   : > { %p133_p1 = scmp.eq.s32.totalorder %s132_s26, 0  ;;  %p146_p2 = scmp.eq.s32.totalorder %s692_s22, 1 }
   0x7   : > { %p151_p3 = scmp.ne.s32.totalorder %s631_s19, %s627_s18  ;;  %p152_p4 = scmp.eq.s32.totalorder %s519_s23, 1 }
   0x8   : > { %s707_s27 = scalar_select %p133_p1, %s635_s20, %s135_s25  }
   0x9   : > { %p709_p5 = por %p146_p2, %p145_p0  ;;  %p713_p6 = por %p152_p4, %p151_p3 }
   0xa   : > { %p522_p7 = scmp.ge.s32.totalorder %s639_s21, 1  ;;  %p189_p8 = scmp.lt.s32.totalorder %s639_s21, 3 }
   0xc   : > { %p190_p9 = pnand %p522_p7, %p189_p8 }
   0xd   : > { %p216_p10 = scmp.lt.s32.totalorder (!%p190_p9), %s692_s22, 1  ;;  %s213_s12 = sand.u32 (!%p190_p9), 1, %s631_s19  }
   0xe   : > { %193 = sbr.rel (%p190_p9) target bundleno = 345 (0x159), region = 40  ;;  %s523_s13 = sshll.u32 (!%p190_p9), %s213_s12, 3 }
   0xf   : > { %s530_s14 = sshll.u32 (!%p190_p9), %s692_s22, 3  ;;  %s215_s26 = scalar_lea.vmem (!%p190_p9), [#allocation2], %s523_s13 }
  0x10   : > { %s455_s25 = scalar_lea.hbm (!%p190_p9), %s932_s5, %s530_s14  ;;  %s457_s30 = sshll.u32 (!%p190_p9), %s215_s26, 4  ;;  %s458_s30 = int_to_ptr.vmem [resolvable:$true] %s457_s30 }
  0x11   : > { %s597_s11 = scalar_lea.hbm (!%p190_p9), %s932_s5, 16 }
  0x13   : > { %v227_v0 = vld [vmem:[%s928_s1 + $0x30] sm:$0xff]  ;;  %v228_v1 = vld [vmem:[%s928_s1 + $0x38] sm:$0xff]  ;;  %v225_v2 = vld [vmem:[%s928_s1 + $0x20] sm:$0xff]  ;;  %s217_s17 = scalar_select %p216_p10, %s692_s22, 1  ;;  %vm235_vm0 = vcmask 261120  }
  0x14   : > { %251 = vmatpush.msra.mxu0 %v227_v0  ;;  %271 = vmatpush.msra.mxu1 %v228_v1  ;;  %v226_v3 = vld [vmem:[%s928_s1 + $0x28] sm:$0xff]  ;;  %v223_v4 = vld [vmem:[%s928_s1 + $0x10] sm:$0xff]  ;;  %v224_v5 = vld [vmem:[%s928_s1 + $0x18] sm:$0xff]  ;;  %s445_s22 = scalar_lea.sflag [#allocation3], %s213_s12 }
  0x15   : > { %v221_v6 = vld [vmem:[%s928_s1] sm:$0xff]  ;;  %v222_v7 = vld [vmem:[%s928_s1 + $0x8] sm:$0xff]  ;;  %s524_s6 = sshll.u32 %s217_s17, 3  ;;  %v382_v9 = vld [vmem:[%s930_s3 + $0x78] sm:$0xff] }
  0x16   : > { %252 = vmatpush.msra.mxu0 %v225_v2  ;;  %272 = vmatpush.msra.mxu1 %v226_v3  ;;  %s219_s9 = scalar_lea.vmem %s927_s0, %s524_s6  ;;  %v398_v10 = vld [vmem:[%s930_s3 + $0xf8] sm:$0xff]  ;;  %v381_v11 = vld [vmem:[%s930_s3 + $0x70] sm:$0xff]  ;;  %v229_v13 = vld [vmem:[%s929_s2] sm:$0x3]  ;;  %s459_s6 = sshll.u32 %s455_s25, 4  ;;  %s460_s6 = int_to_ptr.hbm [resolvable:$true] %s459_s6 }
  0x17   : > { %v220_v8 = vld [vmem:[%s219_s9] sm:$0xff]  ;;  %403 = vmatpush.msra.mxu2 %v382_v9  ;;  %423 = vmatpush.msra.mxu3 %v398_v10  ;;  %v397_v12 = vld [vmem:[%s930_s3 + $0xf0] sm:$0xff]  ;;  %v380_v14 = vld [vmem:[%s930_s3 + $0x68] sm:$0xff]  ;;  %v231_v18 = vperm.slane %v229_v13, 0  ;;  %v232_v19 = vperm.slane %v229_v13, 1  ;;  %s591_s7 = sshra.s32 %s460_s6, 4  ;;  %s592_s7 = int_to_ptr.hbm [resolvable:$true] %s591_s7 }
  0x18   : > { %253 = vmatpush.msra.mxu0 %v223_v4  ;;  %273 = vmatpush.msra.mxu1 %v224_v5  ;;  %v396_v15 = vld [vmem:[%s930_s3 + $0xe8] sm:$0xff]  ;;  %v379_v16 = vld [vmem:[%s930_s3 + $0x60] sm:$0xff]  ;;  %v378_v20 = vld [vmem:[%s930_s3 + $0x58] sm:$0xff]  ;;  %s593_s8 = scalar_lea.hbm %s592_s7, 8  ;;  %p598_p0 = scmp.lt.s32.totalorder %s592_s7, %s932_s5 }
  0x19   : > { %404 = vmatpush.msra.mxu2 %v381_v11  ;;  %424 = vmatpush.msra.mxu3 %v397_v12  ;;  %v395_v17 = vld [vmem:[%s930_s3 + $0xe0] sm:$0xff]  ;;  %v394_v21 = vld [vmem:[%s930_s3 + $0xd8] sm:$0xff]  ;;  %v377_v22 = vld [vmem:[%s930_s3 + $0x50] sm:$0xff]  ;;  %p594_p11 = scmp.ne.s32.totalorder %s592_s7, %s593_s8  ;;  %p599_p1 = scmp.lt.s32.totalorder %s597_s11, %s593_s8 }
  0x1a   : > { %254 = vmatpush.msra.mxu0 %v221_v6  ;;  %274 = vmatpush.msra.mxu1 %v222_v7  ;;  %v393_v23 = vld [vmem:[%s930_s3 + $0xd0] sm:$0xff]  ;;  %v376_v26 = vld [vmem:[%s930_s3 + $0x48] sm:$0xff]  ;;  %v375_v30 = vld [vmem:[%s930_s3 + $0x40] sm:$0xff] }
  0x1b   : > { %525 = vmatmul.msk.f32.vlgmr.msra.gmra.mxu0 %vm235_vm0, %v220_v8  ;;  %526 = vmatmul.msk.f32.vlgmr.msra.gmra.mxu1 %vm235_vm0, %v220_v8  ;;  %v392_v27 = vld [vmem:[%s930_s3 + $0xc8] sm:$0xff]  ;;  %v391_v31 = vld [vmem:[%s930_s3 + $0xc0] sm:$0xff]  ;;  %v374_v34 = vld [vmem:[%s930_s3 + $0x38] sm:$0xff]  ;;  %p595_p12 = pnand %p594_p11, %p709_p5  ;;  %p600_p2 = por %p599_p1, %p598_p0 }
  0x1c   : > { %405 = vmatpush.msra.mxu2 %v380_v14  ;;  %425 = vmatpush.msra.mxu3 %v396_v15  ;;  %v390_v35 = vld [vmem:[%s930_s3 + $0xb8] sm:$0xff]  ;;  %v373_v38 = vld [vmem:[%s930_s3 + $0x30] sm:$0xff]  ;;  %v372_v42 = vld [vmem:[%s930_s3 + $0x28] sm:$0xff] }
  0x1d   : > { %v389_v39 = vld [vmem:[%s930_s3 + $0xb0] sm:$0xff]  ;;  %v388_v43 = vld [vmem:[%s930_s3 + $0xa8] sm:$0xff]  ;;  %v371_v47 = vld [vmem:[%s930_s3 + $0x20] sm:$0xff]  ;;  %p596_p13 = pneg %p595_p12 }
  0x1e   : > { %406 = vmatpush.msra.mxu2 %v379_v16  ;;  %426 = vmatpush.msra.mxu3 %v395_v17  ;;  %v387_v48 = vld [vmem:[%s930_s3 + $0xa0] sm:$0xff]  ;;  %v370_v53 = vld [vmem:[%s930_s3 + $0x18] sm:$0xff]  ;;  %v369_v59 = vld [vmem:[%s930_s3 + $0x10] sm:$0xff] }
  0x1f   : > { %v386_v54 = vld [vmem:[%s930_s3 + $0x98] sm:$0xff]  ;;  %v385_v60 = vld [vmem:[%s930_s3 + $0x90] sm:$0xff]  ;;  %v368_v0 = vld [vmem:[%s930_s3 + $0x8] sm:$0xff]  ;;  %p601_p3 = pnand %p600_p2, %p596_p13 }
  0x20   : > { %407 = vmatpush.msra.mxu2 %v378_v20  ;;  %427 = vmatpush.msra.mxu3 %v394_v21  ;;  %v384_v1 = vld [vmem:[%s930_s3 + $0x88] sm:$0xff]  ;;  %v367_v5 = vld [vmem:[%s930_s3] sm:$0xff] }
  0x21   : > { %v383_v6 = vld [vmem:[%s930_s3 + $0x80] sm:$0xff] }
  0x22   : > { %408 = vmatpush.msra.mxu2 %v377_v22  ;;  %428 = vmatpush.msra.mxu3 %v393_v23 }
  0x24   : > { %409 = vmatpush.msra.mxu2 %v376_v26  ;;  %429 = vmatpush.msra.mxu3 %v392_v27 }
  0x26   : > { %410 = vmatpush.msra.mxu2 %v375_v30  ;;  %430 = vmatpush.msra.mxu3 %v391_v31 }
  0x28   : > { %411 = vmatpush.msra.mxu2 %v374_v34  ;;  %431 = vmatpush.msra.mxu3 %v390_v35 }
  0x2a   : > { %412 = vmatpush.msra.mxu2 %v373_v38  ;;  %432 = vmatpush.msra.mxu3 %v389_v39 }
  0x2c   : > { %413 = vmatpush.msra.mxu2 %v372_v42  ;;  %433 = vmatpush.msra.mxu3 %v388_v43 }
  0x2e   : > { %414 = vmatpush.msra.mxu2 %v371_v47  ;;  %434 = vmatpush.msra.mxu3 %v387_v48 }
  0x30   : > { %415 = vmatpush.msra.mxu2 %v370_v53  ;;  %435 = vmatpush.msra.mxu3 %v386_v54 }
  0x32   : > { %416 = vmatpush.msra.mxu2 %v369_v59  ;;  %436 = vmatpush.msra.mxu3 %v385_v60 }
  0x34   : > { %417 = vmatpush.msra.mxu2 %v368_v0  ;;  %437 = vmatpush.msra.mxu3 %v384_v1 }
  0x36   : > { %418 = vmatpush.msra.mxu2 %v367_v5  ;;  %438 = vmatpush.msra.mxu3 %v383_v6 }
  0x98   : > { %v256_v24 = vpop.f32.mrf.mxu0  ;;  %v276_v25 = vpop.f32.mrf.mxu1 }
  0x99   : > { %v795_v28 = vadd.f32 %v256_v24, %v231_v18  ;;  %v797_v29 = vadd.f32 %v276_v25, %v232_v19 }
  0x9b   : > { %v806_v32 = vmul.f32 0.70710677, %v795_v28  ;;  %v809_v33 = vmul.f32 0.70710677, %v797_v29  ;;  %v279_v60 = vmul.f32 0.5, %v795_v28 }
  0x9d   : > { %v283_v36 = vmul.f32 %v806_v32, %v806_v32  ;;  %v323_v37 = vmul.f32 %v809_v33, %v809_v33 }
  0x9f   : > { %v827_v40 = vmin.f32 %v283_v36, 16.0  ;;  %v829_v41 = vmin.f32 %v323_v37, 16.0 }
  0xa1   : > { %v285_v44 = vmul.f32 2.1237322e-06, %v827_v40  ;;  %v325_v45 = vmul.f32 2.1237322e-06, %v829_v41  ;;  %v296_v46 = vmul.f32 3.8918573e-05, %v827_v40 }
  0xa2   : > { %v336_v49 = vmul.f32 3.8918573e-05, %v829_v41 }
  0xa3   : > { %v286_v50 = vadd.f32 0.00028619796, %v285_v44  ;;  %v326_v51 = vadd.f32 0.00028619796, %v325_v45  ;;  %v297_v52 = vadd.f32 0.001143296, %v296_v46 }
  0xa4   : > { %v337_v55 = vadd.f32 0.001143296, %v336_v49 }
  0xa5   : > { %v287_v56 = vmul.f32 %v286_v50, %v827_v40  ;;  %v327_v57 = vmul.f32 %v326_v51, %v829_v41  ;;  %v298_v58 = vmul.f32 %v297_v52, %v827_v40 }
  0xa6   : > { %v338_v61 = vmul.f32 %v337_v55, %v829_v41 }
  0xa7   : > { %v288_v62 = vadd.f32 0.0036580483, %v287_v56  ;;  %v299_v63 = vadd.f32 0.014752088, %v298_v58  ;;  %v328_v3 = vadd.f32 0.0036580483, %v327_v57 }
  0xa8   : > { %v339_v2 = vadd.f32 0.014752088, %v338_v61 }
  0xa9   : > { %v300_v4 = vmul.f32 %v299_v63, %v827_v40  ;;  %v289_v8 = vmul.f32 %v288_v62, %v827_v40  ;;  %v329_v11 = vmul.f32 %v328_v3, %v829_v41 }
  0xaa   : > { %v340_v7 = vmul.f32 %v339_v2, %v829_v41 }
  0xab   : > { %v301_v9 = vadd.f32 0.112945676, %v300_v4  ;;  %v290_v14 = vadd.f32 0.05243302, %v289_v8  ;;  %v330_v17 = vadd.f32 0.05243302, %v329_v11 }
  0xac   : > { %v341_v10 = vadd.f32 0.112945676, %v340_v7 }
  0xad   : > { %v302_v12 = vmul.f32 %v301_v9, %v827_v40  ;;  %v291_v20 = vmul.f32 %v290_v14, %v827_v40  ;;  %v331_v23 = vmul.f32 %v330_v17, %v829_v41 }
  0xae   : > { %v342_v13 = vmul.f32 %v341_v10, %v829_v41 }
  0xaf   : > { %v303_v15 = vadd.f32 0.4994258, %v302_v12  ;;  %v292_v24 = vadd.f32 0.18741608, %v291_v20  ;;  %v332_v25 = vadd.f32 0.18741608, %v331_v23 }
  0xb0   : > { %v343_v16 = vadd.f32 0.4994258, %v342_v13 }
  0xb1   : > { %v304_v18 = vmul.f32 %v303_v15, %v827_v40  ;;  %v293_v27 = vmul.f32 %v292_v24, %v827_v40  ;;  %v333_v34 = vmul.f32 %v332_v25, %v829_v41 }
  0xb2   : > { %v344_v19 = vmul.f32 %v343_v16, %v829_v41 }
  0xb3   : > { %v305_v21 = vadd.f32 1.0, %v304_v18  ;;  %v294_v37 = vadd.f32 1.1283791, %v293_v27  ;;  %v334_v45 = vadd.f32 1.1283791, %v333_v34 }
  0xb4   : > { %v345_v22 = vadd.f32 1.0, %v344_v19 }
  0xb5   : > { %573 = vrcp.f32 %v305_v21  ;;  %v317_v38 = vand.u32 2147483648, %v305_v21  ;;  %v315_v43 = vand.u32 2147483647, %v305_v21  ;;  %vm311_vm3 = vweird.f32 %v305_v21 }
  0xb6   : > { %575 = vrcp.f32 %v345_v22  ;;  %v357_v44 = vand.u32 2147483648, %v345_v22  ;;  %v355_v47 = vand.u32 2147483647, %v345_v22  ;;  %vm351_vm5 = vweird.f32 %v345_v22 }
  0xb7   : > { %v318_v40 = vor.u32 1.1754944e-38, %v317_v38  ;;  %v295_v41 = vmul.f32 %v294_v37, %v806_v32  ;;  %vm316_vm6 = vcmp.eq.f32.partialorder %v315_v43, 8.507059e+37  ;;  %v335_v52 = vmul.f32 %v334_v45, %v809_v33  ;;  %v572_v33 = vld [vmem:[%s931_s4] ss:$0 sm:$0xff] }
  0xb8   : > { %v358_v51 = vor.u32 1.1754944e-38, %v357_v44  ;;  %vm356_vm8 = vcmp.eq.f32.partialorder %v355_v47, 8.507059e+37  ;;  %v280_v32 = vmul.f32 0.5, %v797_v29 }
  0xbb   : > { %v574_v26 = vpop.eup %573 }
  0xbc   : > { %v576_v30 = vpop.eup %575  ;;  %v307_v31 = vmul.f32 %v574_v26, %v305_v21  ;;  %vm312_vm1 = vweird.f32 %v574_v26 }
  0xbd   : > { %v347_v35 = vmul.f32 %v576_v30, %v345_v22  ;;  %vm352_vm2 = vweird.f32 %v576_v30  ;;  %vm313_vm4 = vmor %vm311_vm3, %vm312_vm1 }
  0xbe   : > { %v308_v36 = vsub.f32 1.0, %v307_v31  ;;  %vm353_vm7 = vmor %vm351_vm5, %vm352_vm2 }
  0xbf   : > { %v348_v39 = vsub.f32 1.0, %v347_v35 }
  0xc0   : > { %v309_v42 = vmul.f32 %v574_v26, %v308_v36 }
  0xc1   : > { %v349_v46 = vmul.f32 %v576_v30, %v348_v39 }
  0xc2   : > { %v310_v48 = vadd.f32 %v574_v26, %v309_v42 }
  0xc3   : > { %v350_v49 = vadd.f32 %v576_v30, %v349_v46 }
  0xc4   : > { %v314_v50 = vsel %vm313_vm4, %v574_v26, %v310_v48 }
  0xc5   : > { %v319_v53 = vsel %vm316_vm6, %v318_v40, %v314_v50  ;;  %v354_v54 = vsel %vm353_vm7, %v576_v30, %v350_v49 }
  0xc6   : > { %v320_v55 = vmul.f32 %v319_v53, %v295_v41  ;;  %v359_v56 = vsel %vm356_vm8, %v358_v51, %v354_v54 }
  0xc7   : > { %v360_v57 = vmul.f32 %v359_v56, %v335_v52 }
  0xc8   : > { %v527_v58 = vclamps-f32 %v320_v55, 1.0 }
  0xc9   : > { %v528_v59 = vclamps-f32 %v360_v57, 1.0 }
  0xca   : > { %v363_v61 = vadd.f32 1.0, %v527_v58 }
  0xcb   : > { %v364_v62 = vadd.f32 1.0, %v528_v59 }
  0xcc   : > { %v365_v63 = vmul.f32 %v363_v61, %v279_v60 }
  0xcd   : > { %v366_v0 = vmul.f32 %v364_v62, %v280_v32 }
  0xce   : > { %419 = vmatmul.f32.vlgmr.msra.gmra.mxu2 %v365_v63 }
  0xcf   : > { %439 = vmatmul.f32.vlgmr.msra.gmra.mxu3 %v366_v0 }
 0x151   : > { %v420_v28 = vpop.f32.mrf.mxu2 }
 0x152   : > { %v421_v29 = vadd.f32 %v572_v33, %v420_v28  ;;  %v440_v1 = vpop.f32.mrf.mxu3 }
 0x154   : > { %v441_v2 = vadd.f32 %v440_v1, %v421_v29 }
 0x156   : > { %443 = vst.msk [vmem:[%s215_s26] sm:$0xff] %vm235_vm0, %v441_v2 }
 0x157   : > { %604 = shalt.err (!%p601_p3)
}
 0x158   : > { %533 = dma.vmem_to_hbm [thread:$0]  (%p709_p5), %s458_s30, 128, %s460_s6, %s445_s22  }
 0x159 PF: > { %p539_p4 = scmp.ge.s32.totalorder %s639_s21, 2  ;;  %s471_s12 = sand.u32 1, %s627_s18  }
 0x15a   : > { %s472_s15 = scalar_lea.sflag [#allocation3], %s471_s12 }
 0x15b   : > { %p536_p7 = pnand %p539_p4, %p713_p6 }
 0x15d   : > { %p537_p8 = pneg %p536_p7 }
 0x15f   : > { %622 = dma.done.wait (%p537_p8), %s472_s15, 128  }
 0x160   : > { %624 = vsyncadd (%p537_p8), %s472_s15, 4294967168  ;;  %p15_p9 = scmp.ge.s32.totalorder %s696_s24, 4   ;;  %s935_s18 = smov %s631_s19 }
 0x161   : > { %s936_s19 = smov %s635_s20  ;;  %s937_s20 = smov %s707_s27 }
 0x162   : > { %s938_s21 = smov %s696_s24  ;;  %17 = sbr.rel (!%p15_p9) target bundleno = 3 (0x3), region = 75 }
 0x167   :  { %478 = vsyncpa [#allocation3], 1 }
 0x168   :  { %480 = vsyncpa [#allocation3 + $0x1], 1 }

</bundles_post_ra>
